<compile_context>
chip_gen: v7x
topology: tpu7x:2x2x1
jax: 0.10.0
libtpu: 0.0.40
codegen_flags: <defaults>
</compile_context>

<pallas_src>
import functools

import jax
import jax.numpy as jnp
from jax.experimental import pallas as pl
from jax.experimental.pallas import tpu as pltpu

NUM_LAYERS = 10   # 5 encoder + 5 decoder Linear layers (after BN folding)
ENC_LAYERS = 5
BN_EPS = 1e-5
LANE = 128


def _round_up(x, m):
    return (x + m - 1) // m * m


def _layer_dims(input_dim, latent_dim):
    return [input_dim, 256, 128, 64, 32, latent_dim,   # encoder
            32, 64, 128, 256, input_dim]               # decoder


# --------------------------------------------------------------------------
# Kernel: fused 10-layer MLP forward on one (TILE_B, *) batch tile.
# --------------------------------------------------------------------------
def _autoencoder_kernel(x_ref, w_ref, b_ref, recon_ref, latent_ref,
                        *, pad_dims, row_offs):
    h = x_ref[...].astype(jnp.float32)                   # (TILE_B, pad_dims[0])
    for layer in range(NUM_LAYERS):
        p_in = pad_dims[layer]
        p_out = pad_dims[layer + 1]
        r0 = row_offs[layer]
        w = w_ref[r0:r0 + p_in, :p_out]                   # bf16, static slice
        b = b_ref[layer, :p_out]                          # f32, static slice
        # bf16 MXU inputs, f32 accumulate; bias-add in f32 on the VPU.
        h = jnp.dot(h.astype(jnp.bfloat16), w,
                    preferred_element_type=jnp.float32) + b[None, :]
        if layer == ENC_LAYERS - 1:
            latent_ref[...] = h.astype(latent_ref.dtype)  # latent (no activation)
        elif layer < NUM_LAYERS - 1:
            h = jnp.maximum(h, 0.0)                       # ReLU (Dropout = identity)
    # Final Sigmoid: exp + approx reciprocal both on the EUP (free slot).
    e = jnp.exp(-h)
    recon_ref[...] = pl.reciprocal(1.0 + e, approx=True).astype(recon_ref.dtype)


# --------------------------------------------------------------------------
# Parameter construction / packing (host-side, done once).
# --------------------------------------------------------------------------
def init_params(key, input_dim, latent_dim):
    """Deterministic init mirroring the PyTorch module's layer shapes.

    Returns a list of (W, b) per Linear layer, with eval-mode BatchNorm1d
    affine folded in. W is (in_features, out_features), b is (out_features,).
    """
    dims = _layer_dims(input_dim, latent_dim)
    # Which Linear layers are followed by BatchNorm1d in the PyTorch module:
    has_bn = [True, True, True, True, False,            # encoder
              True, True, True, True, False]            # decoder

    params = []
    for layer in range(NUM_LAYERS):
        fan_in, fan_out = dims[layer], dims[layer + 1]
        key, kw, kb, kg, kbe = jax.random.split(key, 5)
        bound = 1.0 / jnp.sqrt(fan_in)
        w = jax.random.uniform(kw, (fan_in, fan_out), jnp.float32, -bound, bound)
        b = jax.random.uniform(kb, (fan_out,), jnp.float32, -bound, bound)
        if has_bn[layer]:
            gamma = 1.0 + 0.1 * jax.random.normal(kg, (fan_out,), jnp.float32)
            beta = 0.1 * jax.random.normal(kbe, (fan_out,), jnp.float32)
            # Fresh BN: running_mean = 0, running_var = 1.
            # TODO(synk): with trained running stats use
            #   scale = gamma/sqrt(var+eps); w *= scale; b = (b-mean)*scale+beta
            scale = gamma / jnp.sqrt(1.0 + BN_EPS)
            w = w * scale[None, :]
            b = b * scale + beta
        params.append((w, b))
    return params


def pack_params(params, input_dim, latent_dim):
    """Pack the 10 (W, b) pairs per-layer into one row-stacked bf16 weight
    slab of shape (sum(pad_in_l), max(pad_out_l)) plus an f32 bias slab,
    zero-padded to 128-lane multiples (padding is mathematically inert)."""
    dims = _layer_dims(input_dim, latent_dim)
    pad_dims = tuple(_round_up(d, LANE) for d in dims)
    max_out = max(pad_dims[1:])

    row_offs, off = [], 0
    for layer in range(NUM_LAYERS):
        row_offs.append(off)
        off += pad_dims[layer]
    total_rows = off

    w_slab = jnp.zeros((total_rows, max_out), jnp.float32)
    b_slab = jnp.zeros((NUM_LAYERS, max_out), jnp.float32)
    for i, (w, b) in enumerate(params):
        r0 = row_offs[i]
        w_slab = w_slab.at[r0:r0 + w.shape[0], :w.shape[1]].set(w)
        b_slab = b_slab.at[i, :b.shape[0]].set(b)
    return w_slab.astype(jnp.bfloat16), b_slab, tuple(row_offs)


# --------------------------------------------------------------------------
# Wrapper: grid over batch tiles, weights resident via constant index_maps.
# --------------------------------------------------------------------------
@functools.partial(jax.jit, static_argnames=("latent_dim", "row_offs",
                                             "tile_b", "out_dtype"))
def autoencoder_forward(x, w_slab, b_slab, *, latent_dim, row_offs,
                        tile_b=1024, out_dtype=jnp.float32):
    b_sz, input_dim = x.shape
    dims = _layer_dims(input_dim, latent_dim)
    pad_dims = tuple(_round_up(d, LANE) for d in dims)
    total_rows, max_out = w_slab.shape

    # Batch tiling: big tiles amortize per-step overhead; multiple of 16 for
    # bf16 sublane packing; never bigger than the (padded) batch.
    tile_b = max(16, min(tile_b, _round_up(b_sz, 16)))
    b_pad = _round_up(b_sz, tile_b)
    # v7x has two TensorCores: a single-step grid leaves one idle, so split
    # the batch into >=2 grid steps when possible (harmless on v5e/v6e).
    if b_pad // tile_b == 1 and tile_b >= 32:
        tile_b //= 2
        b_pad = _round_up(b_sz, tile_b)

    # bf16 input (cast happens before the first matmul anyway). Skip the
    # extra zero-slab materialization entirely when already aligned; padded
    # columns/rows must be exactly zero for matmul correctness.
    if b_pad == b_sz and pad_dims[0] == input_dim:
        x_p = x.astype(jnp.bfloat16)
    else:
        x_p = (jnp.zeros((b_pad, pad_dims[0]), jnp.bfloat16)
               .at[:b_sz, :input_dim].set(x.astype(jnp.bfloat16)))

    out_bytes = jnp.dtype(out_dtype).itemsize
    vmem_bytes = (
        tile_b * pad_dims[0] * 2 * 2                      # bf16 x, double buffer
        + total_rows * max_out * 2                        # bf16 weights, single buffer
        + _round_up(NUM_LAYERS, 8) * max_out * 4          # biases
        + tile_b * pad_dims[-1] * out_bytes * 2           # recon, double buffer
        + tile_b * pad_dims[ENC_LAYERS] * out_bytes * 2   # latent, double buffer
        + tile_b * max(pad_dims) * 4 * 4                  # live f32 activations
    )
    vmem_bytes = min(int(vmem_bytes * 1.5) + (4 << 20), 64 << 20)

    kernel = functools.partial(_autoencoder_kernel,
                               pad_dims=pad_dims, row_offs=row_offs)
    grid = (b_pad // tile_b,)

    recon_p, latent_p = pl.pallas_call(
        kernel,
        grid=grid,
        in_specs=[
            pl.BlockSpec((tile_b, pad_dims[0]), lambda i: (i, 0)),
            # Constant block index -> params fetched once and stay resident;
            # Buffered(1): no pointless double buffer for never-changing blocks.
            pl.BlockSpec((total_rows, max_out), lambda i: (0, 0),
                         pipeline_mode=pl.Buffered(buffer_count=1)),
            pl.BlockSpec((NUM_LAYERS, max_out), lambda i: (0, 0),
                         pipeline_mode=pl.Buffered(buffer_count=1)),
        ],
        out_specs=(
            pl.BlockSpec((tile_b, pad_dims[-1]), lambda i: (i, 0)),
            pl.BlockSpec((tile_b, pad_dims[ENC_LAYERS]), lambda i: (i, 0)),
        ),
        out_shape=(
            jax.ShapeDtypeStruct((b_pad, pad_dims[-1]), out_dtype),
            jax.ShapeDtypeStruct((b_pad, pad_dims[ENC_LAYERS]), out_dtype),
        ),
        compiler_params=pltpu.CompilerParams(
            dimension_semantics=("parallel",),   # shard batch tiles across TCs
            vmem_limit_bytes=vmem_bytes,
        ),
    )(x_p, w_slab, b_slab)

    # Slice true widths / batch back out (padding columns hold 0 / sigmoid(0)).
    return recon_p[:b_sz, :input_dim], latent_p[:b_sz, :latent_dim]


# --------------------------------------------------------------------------
# Pure-JAX reference mirroring the kernel's numerics (bf16 MXU, f32 acc).
# --------------------------------------------------------------------------
def _reference_forward(x, params):
    h = x
    latent = None
    for i, (w, b) in enumerate(params):
        h = jnp.dot(h.astype(jnp.bfloat16), w.astype(jnp.bfloat16),
                    preferred_element_type=jnp.float32) + b[None, :]
        if i == ENC_LAYERS - 1:
            latent = h
        elif i < NUM_LAYERS - 1:
            h = jnp.maximum(h, 0.0)
    return jax.nn.sigmoid(h), latent


if __name__ == "__main__":
    BATCH = 16
    INPUT_DIM = 64
    LATENT_DIM = 16

    key = jax.random.PRNGKey(0)
    key, kx, kp = jax.random.split(key, 3)
    x = jax.random.uniform(kx, (BATCH, INPUT_DIM), jnp.float32)
    params = init_params(kp, INPUT_DIM, LATENT_DIM)
    w_slab, b_slab, row_offs = pack_params(params, INPUT_DIM, LATENT_DIM)

    recon, latent = autoencoder_forward(
        x, w_slab, b_slab, latent_dim=LATENT_DIM, row_offs=row_offs)
    jax.block_until_ready((recon, latent))

    ref_recon, ref_latent = _reference_forward(x, params)
    assert recon.shape == (BATCH, INPUT_DIM)
    assert latent.shape == (BATCH, LATENT_DIM)
    assert jnp.allclose(recon, ref_recon, atol=5e-3, rtol=5e-3), \
        float(jnp.max(jnp.abs(recon - ref_recon)))
    assert jnp.allclose(latent, ref_latent, atol=5e-3, rtol=5e-3), \
        float(jnp.max(jnp.abs(latent - ref_latent)))

    print("KERNEL_OK")
</pallas_src>

<mosaic_0001>
module attributes {stable_mosaic.version = 11 : i64} {
  func.func @_autoencoder_kernel(%arg0: i32, %arg1: memref<16x128xbf16, #tpu.memory_space<vmem>>, %arg2: memref<1536x256xbf16, #tpu.memory_space<vmem>>, %arg3: memref<10x256xf32, #tpu.memory_space<vmem>>, %arg4: memref<16x128xf32, #tpu.memory_space<vmem>>, %arg5: memref<16x128xf32, #tpu.memory_space<vmem>>) attributes {dimension_semantics = [#tpu.dimension_semantics<parallel>], iteration_bounds = array<i64: 1>, scalar_prefetch = 0 : i64, scratch_operands = 0 : i64, tpu.core_type = #tpu.core_type<tc>, window_params = [{transform_indices = @transform_0, window_bounds = array<i64: 16, 128>}, {pipeline_mode = #tpu.pipeline_mode<synchronous>, transform_indices = @transform_1, window_bounds = array<i64: 1536, 256>}, {pipeline_mode = #tpu.pipeline_mode<synchronous>, transform_indices = @transform_2, window_bounds = array<i64: 10, 256>}, {transform_indices = @transform_3, window_bounds = array<i64: 16, 128>}, {transform_indices = @transform_4, window_bounds = array<i64: 16, 128>}]} {
    %c0 = arith.constant 0 : index
    %c0_0 = arith.constant 0 : index
    %0 = vector.load %arg1[%c0, %c0_0] : memref<16x128xbf16, #tpu.memory_space<vmem>>, vector<16x128xbf16>
    %1 = arith.extf %0 : vector<16x128xbf16> to vector<16x128xf32>
    %c0_1 = arith.constant 0 : index
    %c0_2 = arith.constant 0 : index
    %2 = vector.load %arg2[%c0_1, %c0_2] : memref<1536x256xbf16, #tpu.memory_space<vmem>>, vector<128x256xbf16>
    %c0_3 = arith.constant 0 : index
    %c0_4 = arith.constant 0 : index
    %3 = vector.load %arg3[%c0_3, %c0_4] : memref<10x256xf32, #tpu.memory_space<vmem>>, vector<1x256xf32>
    %4 = vector.shape_cast %3 : vector<1x256xf32> to vector<256xf32>
    %5 = arith.truncf %1 : vector<16x128xf32> to vector<16x128xbf16>
    %cst = arith.constant dense<0.000000e+00> : vector<16x256xf32>
    %6 = tpu.matmul %5, %2, %cst {dimension_numbers = #tpu.dot_dimension_numbers<[1], [0], [0], [1], [0, 0, 1, 1], [], []>} : vector<16x128xbf16>, vector<128x256xbf16>, vector<16x256xf32> -> vector<16x256xf32>
    %7 = vector.shape_cast %4 : vector<256xf32> to vector<1x256xf32>
    %8 = vector.broadcast %7 : vector<1x256xf32> to vector<16x256xf32>
    %9 = arith.addf %6, %8 : vector<16x256xf32>
    %cst_5 = arith.constant 0.000000e+00 : f32
    %10 = vector.broadcast %cst_5 : f32 to vector<16x256xf32>
    %11 = arith.maximumf %9, %10 : vector<16x256xf32>
    %c128 = arith.constant 128 : index
    %c0_6 = arith.constant 0 : index
    %12 = vector.load %arg2[%c128, %c0_6] : memref<1536x256xbf16, #tpu.memory_space<vmem>>, vector<256x128xbf16>
    %c1 = arith.constant 1 : index
    %c0_7 = arith.constant 0 : index
    %13 = vector.load %arg3[%c1, %c0_7] : memref<10x256xf32, #tpu.memory_space<vmem>>, vector<1x128xf32>
    %14 = vector.shape_cast %13 : vector<1x128xf32> to vector<128xf32>
    %15 = arith.truncf %11 : vector<16x256xf32> to vector<16x256xbf16>
    %cst_8 = arith.constant dense<0.000000e+00> : vector<16x128xf32>
    %16 = tpu.matmul %15, %12, %cst_8 {dimension_numbers = #tpu.dot_dimension_numbers<[1], [0], [0], [1], [0, 0, 1, 1], [], []>} : vector<16x256xbf16>, vector<256x128xbf16>, vector<16x128xf32> -> vector<16x128xf32>
    %17 = vector.shape_cast %14 : vector<128xf32> to vector<1x128xf32>
    %18 = vector.broadcast %17 : vector<1x128xf32> to vector<16x128xf32>
    %19 = arith.addf %16, %18 : vector<16x128xf32>
    %cst_9 = arith.constant 0.000000e+00 : f32
    %20 = vector.broadcast %cst_9 : f32 to vector<16x128xf32>
    %21 = arith.maximumf %19, %20 : vector<16x128xf32>
    %c384 = arith.constant 384 : index
    %c0_10 = arith.constant 0 : index
    %22 = vector.load %arg2[%c384, %c0_10] : memref<1536x256xbf16, #tpu.memory_space<vmem>>, vector<128x128xbf16>
    %c2 = arith.constant 2 : index
    %c0_11 = arith.constant 0 : index
    %23 = vector.load %arg3[%c2, %c0_11] : memref<10x256xf32, #tpu.memory_space<vmem>>, vector<1x128xf32>
    %24 = vector.shape_cast %23 : vector<1x128xf32> to vector<128xf32>
    %25 = arith.truncf %21 : vector<16x128xf32> to vector<16x128xbf16>
    %cst_12 = arith.constant dense<0.000000e+00> : vector<16x128xf32>
    %26 = tpu.matmul %25, %22, %cst_12 {dimension_numbers = #tpu.dot_dimension_numbers<[1], [0], [0], [1], [0, 0, 1, 1], [], []>} : vector<16x128xbf16>, vector<128x128xbf16>, vector<16x128xf32> -> vector<16x128xf32>
    %27 = vector.shape_cast %24 : vector<128xf32> to vector<1x128xf32>
    %28 = vector.broadcast %27 : vector<1x128xf32> to vector<16x128xf32>
    %29 = arith.addf %26, %28 : vector<16x128xf32>
    %cst_13 = arith.constant 0.000000e+00 : f32
    %30 = vector.broadcast %cst_13 : f32 to vector<16x128xf32>
    %31 = arith.maximumf %29, %30 : vector<16x128xf32>
    %c512 = arith.constant 512 : index
    %c0_14 = arith.constant 0 : index
    %32 = vector.load %arg2[%c512, %c0_14] : memref<1536x256xbf16, #tpu.memory_space<vmem>>, vector<128x128xbf16>
    %c3 = arith.constant 3 : index
    %c0_15 = arith.constant 0 : index
    %33 = vector.load %arg3[%c3, %c0_15] : memref<10x256xf32, #tpu.memory_space<vmem>>, vector<1x128xf32>
    %34 = vector.shape_cast %33 : vector<1x128xf32> to vector<128xf32>
    %35 = arith.truncf %31 : vector<16x128xf32> to vector<16x128xbf16>
    %cst_16 = arith.constant dense<0.000000e+00> : vector<16x128xf32>
    %36 = tpu.matmul %35, %32, %cst_16 {dimension_numbers = #tpu.dot_dimension_numbers<[1], [0], [0], [1], [0, 0, 1, 1], [], []>} : vector<16x128xbf16>, vector<128x128xbf16>, vector<16x128xf32> -> vector<16x128xf32>
    %37 = vector.shape_cast %34 : vector<128xf32> to vector<1x128xf32>
    %38 = vector.broadcast %37 : vector<1x128xf32> to vector<16x128xf32>
    %39 = arith.addf %36, %38 : vector<16x128xf32>
    %cst_17 = arith.constant 0.000000e+00 : f32
    %40 = vector.broadcast %cst_17 : f32 to vector<16x128xf32>
    %41 = arith.maximumf %39, %40 : vector<16x128xf32>
    %c640 = arith.constant 640 : index
    %c0_18 = arith.constant 0 : index
    %42 = vector.load %arg2[%c640, %c0_18] : memref<1536x256xbf16, #tpu.memory_space<vmem>>, vector<128x128xbf16>
    %c4 = arith.constant 4 : index
    %c0_19 = arith.constant 0 : index
    %43 = vector.load %arg3[%c4, %c0_19] : memref<10x256xf32, #tpu.memory_space<vmem>>, vector<1x128xf32>
    %44 = vector.shape_cast %43 : vector<1x128xf32> to vector<128xf32>
    %45 = arith.truncf %41 : vector<16x128xf32> to vector<16x128xbf16>
    %cst_20 = arith.constant dense<0.000000e+00> : vector<16x128xf32>
    %46 = tpu.matmul %45, %42, %cst_20 {dimension_numbers = #tpu.dot_dimension_numbers<[1], [0], [0], [1], [0, 0, 1, 1], [], []>} : vector<16x128xbf16>, vector<128x128xbf16>, vector<16x128xf32> -> vector<16x128xf32>
    %47 = vector.shape_cast %44 : vector<128xf32> to vector<1x128xf32>
    %48 = vector.broadcast %47 : vector<1x128xf32> to vector<16x128xf32>
    %49 = arith.addf %46, %48 : vector<16x128xf32>
    %c0_21 = arith.constant 0 : index
    %c0_22 = arith.constant 0 : index
    %50 = vector.load %arg5[%c0_21, %c0_22] : memref<16x128xf32, #tpu.memory_space<vmem>>, vector<16x128xf32>
    tpu.vector_store %arg5[%c0_21, %c0_22], %49 {strides = array<i32>} : memref<16x128xf32, #tpu.memory_space<vmem>>, vector<16x128xf32>,
    %c768 = arith.constant 768 : index
    %c0_23 = arith.constant 0 : index
    %51 = vector.load %arg2[%c768, %c0_23] : memref<1536x256xbf16, #tpu.memory_space<vmem>>, vector<128x128xbf16>
    %c5 = arith.constant 5 : index
    %c0_24 = arith.constant 0 : index
    %52 = vector.load %arg3[%c5, %c0_24] : memref<10x256xf32, #tpu.memory_space<vmem>>, vector<1x128xf32>
    %53 = vector.shape_cast %52 : vector<1x128xf32> to vector<128xf32>
    %54 = arith.truncf %49 : vector<16x128xf32> to vector<16x128xbf16>
    %cst_25 = arith.constant dense<0.000000e+00> : vector<16x128xf32>
    %55 = tpu.matmul %54, %51, %cst_25 {dimension_numbers = #tpu.dot_dimension_numbers<[1], [0], [0], [1], [0, 0, 1, 1], [], []>} : vector<16x128xbf16>, vector<128x128xbf16>, vector<16x128xf32> -> vector<16x128xf32>
    %56 = vector.shape_cast %53 : vector<128xf32> to vector<1x128xf32>
    %57 = vector.broadcast %56 : vector<1x128xf32> to vector<16x128xf32>
    %58 = arith.addf %55, %57 : vector<16x128xf32>
    %cst_26 = arith.constant 0.000000e+00 : f32
    %59 = vector.broadcast %cst_26 : f32 to vector<16x128xf32>
    %60 = arith.maximumf %58, %59 : vector<16x128xf32>
    %c896 = arith.constant 896 : index
    %c0_27 = arith.constant 0 : index
    %61 = vector.load %arg2[%c896, %c0_27] : memref<1536x256xbf16, #tpu.memory_space<vmem>>, vector<128x128xbf16>
    %c6 = arith.constant 6 : index
    %c0_28 = arith.constant 0 : index
    %62 = vector.load %arg3[%c6, %c0_28] : memref<10x256xf32, #tpu.memory_space<vmem>>, vector<1x128xf32>
    %63 = vector.shape_cast %62 : vector<1x128xf32> to vector<128xf32>
    %64 = arith.truncf %60 : vector<16x128xf32> to vector<16x128xbf16>
    %cst_29 = arith.constant dense<0.000000e+00> : vector<16x128xf32>
    %65 = tpu.matmul %64, %61, %cst_29 {dimension_numbers = #tpu.dot_dimension_numbers<[1], [0], [0], [1], [0, 0, 1, 1], [], []>} : vector<16x128xbf16>, vector<128x128xbf16>, vector<16x128xf32> -> vector<16x128xf32>
    %66 = vector.shape_cast %63 : vector<128xf32> to vector<1x128xf32>
    %67 = vector.broadcast %66 : vector<1x128xf32> to vector<16x128xf32>
    %68 = arith.addf %65, %67 : vector<16x128xf32>
    %cst_30 = arith.constant 0.000000e+00 : f32
    %69 = vector.broadcast %cst_30 : f32 to vector<16x128xf32>
    %70 = arith.maximumf %68, %69 : vector<16x128xf32>
    %c1024 = arith.constant 1024 : index
    %c0_31 = arith.constant 0 : index
    %71 = vector.load %arg2[%c1024, %c0_31] : memref<1536x256xbf16, #tpu.memory_space<vmem>>, vector<128x128xbf16>
    %c7 = arith.constant 7 : index
    %c0_32 = arith.constant 0 : index
    %72 = vector.load %arg3[%c7, %c0_32] : memref<10x256xf32, #tpu.memory_space<vmem>>, vector<1x128xf32>
    %73 = vector.shape_cast %72 : vector<1x128xf32> to vector<128xf32>
    %74 = arith.truncf %70 : vector<16x128xf32> to vector<16x128xbf16>
    %cst_33 = arith.constant dense<0.000000e+00> : vector<16x128xf32>
    %75 = tpu.matmul %74, %71, %cst_33 {dimension_numbers = #tpu.dot_dimension_numbers<[1], [0], [0], [1], [0, 0, 1, 1], [], []>} : vector<16x128xbf16>, vector<128x128xbf16>, vector<16x128xf32> -> vector<16x128xf32>
    %76 = vector.shape_cast %73 : vector<128xf32> to vector<1x128xf32>
    %77 = vector.broadcast %76 : vector<1x128xf32> to vector<16x128xf32>
    %78 = arith.addf %75, %77 : vector<16x128xf32>
    %cst_34 = arith.constant 0.000000e+00 : f32
    %79 = vector.broadcast %cst_34 : f32 to vector<16x128xf32>
    %80 = arith.maximumf %78, %79 : vector<16x128xf32>
    %c1152 = arith.constant 1152 : index
    %c0_35 = arith.constant 0 : index
    %81 = vector.load %arg2[%c1152, %c0_35] : memref<1536x256xbf16, #tpu.memory_space<vmem>>, vector<128x256xbf16>
    %c8 = arith.constant 8 : index
    %c0_36 = arith.constant 0 : index
    %82 = vector.load %arg3[%c8, %c0_36] : memref<10x256xf32, #tpu.memory_space<vmem>>, vector<1x256xf32>
    %83 = vector.shape_cast %82 : vector<1x256xf32> to vector<256xf32>
    %84 = arith.truncf %80 : vector<16x128xf32> to vector<16x128xbf16>
    %cst_37 = arith.constant dense<0.000000e+00> : vector<16x256xf32>
    %85 = tpu.matmul %84, %81, %cst_37 {dimension_numbers = #tpu.dot_dimension_numbers<[1], [0], [0], [1], [0, 0, 1, 1], [], []>} : vector<16x128xbf16>, vector<128x256xbf16>, vector<16x256xf32> -> vector<16x256xf32>
    %86 = vector.shape_cast %83 : vector<256xf32> to vector<1x256xf32>
    %87 = vector.broadcast %86 : vector<1x256xf32> to vector<16x256xf32>
    %88 = arith.addf %85, %87 : vector<16x256xf32>
    %cst_38 = arith.constant 0.000000e+00 : f32
    %89 = vector.broadcast %cst_38 : f32 to vector<16x256xf32>
    %90 = arith.maximumf %88, %89 : vector<16x256xf32>
    %c1280 = arith.constant 1280 : index
    %c0_39 = arith.constant 0 : index
    %91 = vector.load %arg2[%c1280, %c0_39] : memref<1536x256xbf16, #tpu.memory_space<vmem>>, vector<256x128xbf16>
    %c9 = arith.constant 9 : index
    %c0_40 = arith.constant 0 : index
    %92 = vector.load %arg3[%c9, %c0_40] : memref<10x256xf32, #tpu.memory_space<vmem>>, vector<1x128xf32>
    %93 = vector.shape_cast %92 : vector<1x128xf32> to vector<128xf32>
    %94 = arith.truncf %90 : vector<16x256xf32> to vector<16x256xbf16>
    %cst_41 = arith.constant dense<0.000000e+00> : vector<16x128xf32>
    %95 = tpu.matmul %94, %91, %cst_41 {dimension_numbers = #tpu.dot_dimension_numbers<[1], [0], [0], [1], [0, 0, 1, 1], [], []>} : vector<16x256xbf16>, vector<256x128xbf16>, vector<16x128xf32> -> vector<16x128xf32>
    %96 = vector.shape_cast %93 : vector<128xf32> to vector<1x128xf32>
    %97 = vector.broadcast %96 : vector<1x128xf32> to vector<16x128xf32>
    %98 = arith.addf %95, %97 : vector<16x128xf32>
    %cst_42 = arith.constant 0.000000e+00 : f32
    %99 = vector.broadcast %cst_42 : f32 to vector<16x128xf32>
    %100 = arith.subf %99, %98 : vector<16x128xf32>
    %101 = math.exp %100 : vector<16x128xf32>
    %cst_43 = arith.constant 1.000000e+00 : f32
    %102 = vector.broadcast %cst_43 : f32 to vector<16x128xf32>
    %103 = arith.addf %102, %101 : vector<16x128xf32>
    %104 = tpu.reciprocal %103 {approx = true} : vector<16x128xf32> -> vector<16x128xf32>
    %c0_44 = arith.constant 0 : index
    %c0_45 = arith.constant 0 : index
    %105 = vector.load %arg4[%c0_44, %c0_45] : memref<16x128xf32, #tpu.memory_space<vmem>>, vector<16x128xf32>
    tpu.vector_store %arg4[%c0_44, %c0_45], %104 {strides = array<i32>} : memref<16x128xf32, #tpu.memory_space<vmem>>, vector<16x128xf32>,
    return
  }
  func.func @transform_0(%arg0: i32) -> (i32, i32) {
    %c0_i32 = arith.constant 0 : i32
    %c0_i32_0 = arith.constant 0 : i32
    return %arg0, %c0_i32 : i32, i32
  }
  func.func @transform_1(%arg0: i32) -> (i32, i32) {
    %c0_i32 = arith.constant 0 : i32
    %c0_i32_0 = arith.constant 0 : i32
    %c0_i32_1 = arith.constant 0 : i32
    return %c0_i32, %c0_i32_0 : i32, i32
  }
  func.func @transform_2(%arg0: i32) -> (i32, i32) {
    %c0_i32 = arith.constant 0 : i32
    %c0_i32_0 = arith.constant 0 : i32
    %c0_i32_1 = arith.constant 0 : i32
    return %c0_i32, %c0_i32_0 : i32, i32
  }
  func.func @transform_3(%arg0: i32) -> (i32, i32) {
    %c0_i32 = arith.constant 0 : i32
    %c0_i32_0 = arith.constant 0 : i32
    return %arg0, %c0_i32 : i32, i32
  }
  func.func @transform_4(%arg0: i32) -> (i32, i32) {
    %c0_i32 = arith.constant 0 : i32
    %c0_i32_0 = arith.constant 0 : i32
    return %arg0, %c0_i32 : i32, i32
  }
}

</mosaic_0001>

<bundles_post_ra>
// kernel: autoencoder_forward.1
= control target key start
LH: loop header
LB: loop body
LE: loop exit
PB: predicated region body
PF: predicated region fallthrough
CT: control target
= control target key end

     0   :  { %10 = vsyncpa [#allocation3], 0  ;;  %s2132_s0 = inlined_call_operand.vmem [shape: bf16[16,128], index: 0, kind: input, shape index: {}]   ;;  %s2133_s1 = inlined_call_operand.hbm [shape: bf16[1536,256], index: 1, kind: input, shape index: {}]   ;;  %s2134_s2 = inlined_call_operand.vmem [shape: f32[10,256], index: 2, kind: input, shape index: {}]   ;;  %s2135_s3 = inlined_call_operand.hbm [shape: f32[16,128], index: 3, kind: output, shape index: {0}]   ;;  %s2136_s4 = inlined_call_operand.hbm [shape: f32[16,128], index: 4, kind: output, shape index: {1}]  }
   0x1   :  { %11 = vsyncpa [#allocation4], 0 }
   0x2   :  { %12 = vsyncpa [#allocation7], 0  ;;  %s1947_s15 = smov [#allocation2]   ;;  %s1875_s19 = scalar_lea.hbm %s2133_s1, 24576 }
   0x3   :  { %s20_s16 = sshll.u32 %s1947_s15, 4  ;;  %p1876_p0 = scmp.ne.s32.totalorder %s2133_s1, %s1875_s19  ;;  %s21_s16 = int_to_ptr.vmem [resolvable:$true] %s20_s16 }
   0x4   :  { %p1879_p1 = scmp.lt.u32.totalorder %s1875_s19, %s2133_s1 }
   0x6   :  { %p1881_p2 = pnand %p1879_p1, %p1876_p0 }
   0x8   :  { %1884 = shalt.err (!%p1881_p2)
}
   0x9   :  { %s1885_s24 = scalar_lea.vmem %s21_s16, 24576  ;;  %p1890_p4 = scmp.lt.s32.totalorder %s21_s16, %s21_s16 }
   0xa   :  { %p1886_p3 = scmp.ne.s32.totalorder %s21_s16, %s1885_s24  ;;  %p1891_p5 = scmp.lt.s32.totalorder %s1885_s24, %s1885_s24 }
   0xc   :  { %p1892_p6 = por %p1891_p5, %p1890_p4 }
   0xe   :  { %p1893_p7 = pnand %p1892_p6, %p1886_p3 }
  0x10   :  { %1896 = shalt.err (!%p1893_p7)
}
  0x11   :  { %s1948_s25 = smov 128   ;;  %s1949_s26 = smov 8  }
  0x12   :  { %26 = dma.hbm_to_vmem [thread:$0]  %s2133_s1, 24576, %s21_s16, [#allocation3], %s1948_s25, %s1948_s25, %s1949_s26  }
  0x13   :  { %1941 = dma.done.wait [#allocation3], 24576  }
  0x14   :  { %1942 = vsyncadd [#allocation3], 4294942720  ;;  %v1950_v0 = vmov 0   ;;  %v1738_v1 = vld [vmem:[#allocation2 + $0x4] ss:$8 sps:$4 sm:$0xff]   ;;  %v1951_v35 = vmov 0.0   ;;  %v53_v40 = vlaneseq }
  0x15   :  { %181 = vmatprep.mubr.bf16.mxu0 %v1950_v0  ;;  %v1740_v2 = vld [vmem:[#allocation2] ss:$8 sps:$4 sm:$0xff]   ;;  %149 = vmatprep.subr.bf16.mxu0 %v1738_v1  ;;  %v1741_v3 = vld [vmem:[#allocation2 + $0x14] ss:$8 sps:$4 sm:$0xff]   ;;  %v1743_v4 = vld [vmem:[#allocation2 + $0x10] ss:$8 sps:$4 sm:$0xff]  }
  0x16   :  { %150 = vmatpush1.bf16.msra.mxu0 %v1740_v2  ;;  %v1744_v5 = vld [vmem:[#allocation2 + $0x24] ss:$8 sps:$4 sm:$0xff]   ;;  %v1746_v6 = vld [vmem:[#allocation2 + $0x20] ss:$8 sps:$4 sm:$0xff]   ;;  %v1747_v7 = vld [vmem:[#allocation2 + $0x34] ss:$8 sps:$4 sm:$0xff]  }
  0x17   :  { %151 = vmatprep.subr.bf16.mxu0 %v1741_v3  ;;  %v1749_v8 = vld [vmem:[#allocation2 + $0x30] ss:$8 sps:$4 sm:$0xff]   ;;  %v1750_v9 = vld [vmem:[#allocation2 + $0x44] ss:$8 sps:$4 sm:$0xff]   ;;  %v1763_v10 = vld [vmem:[#allocation2 + $0x100] ss:$8 sps:$4 sm:$0xff]  }
  0x18   :  { %v1752_v11 = vld [vmem:[#allocation2 + $0x40] ss:$8 sps:$4 sm:$0xff]   ;;  %v1753_v13 = vld [vmem:[#allocation2 + $0x54] ss:$8 sps:$4 sm:$0xff]   ;;  %1512 = vmatprep.subr.bf16.mxu1 %v1763_v10  ;;  %v1765_v14 = vld [vmem:[#allocation2 + $0x110] ss:$8 sps:$4 sm:$0xff]  }
  0x19   :  { %v1764_v12 = vld [vmem:[#allocation2 + $0x80] ss:$8 sps:$4 sm:$0xff]   ;;  %v1766_v15 = vld [vmem:[#allocation2 + $0x90] ss:$8 sps:$4 sm:$0xff]   ;;  %v1756_v18 = vld [vmem:[#allocation2 + $0x64] ss:$8 sps:$4 sm:$0xff]  }
  0x1a   :  { %152 = vmatpush1.bf16.msra.mxu0 %v1743_v4  ;;  %1513 = vmatpush3.bf16.msra.mxu1 %v1764_v12  ;;  %v1767_v16 = vld [vmem:[#allocation2 + $0x120] ss:$8 sps:$4 sm:$0xff]   ;;  %v1755_v17 = vld [vmem:[#allocation2 + $0x50] ss:$8 sps:$4 sm:$0xff]   ;;  %v1759_v22 = vld [vmem:[#allocation2 + $0x74] ss:$8 sps:$4 sm:$0xff]  }
  0x1b   :  { %153 = vmatprep.subr.bf16.mxu0 %v1744_v5  ;;  %1514 = vmatprep.subr.bf16.mxu1 %v1765_v14  ;;  %v1768_v19 = vld [vmem:[#allocation2 + $0xa0] ss:$8 sps:$4 sm:$0xff]   ;;  %v1769_v20 = vld [vmem:[#allocation2 + $0x130] ss:$8 sps:$4 sm:$0xff]   ;;  %v2006_v41 = vshrl.u32 %v53_v40, 7  ;;  %vm1952_vm0 = vmmov 0  }
  0x1c   :  { %v1758_v21 = vld [vmem:[#allocation2 + $0x60] ss:$8 sps:$4 sm:$0xff]   ;;  %v1770_v23 = vld [vmem:[#allocation2 + $0xb0] ss:$8 sps:$4 sm:$0xff]   ;;  %s1953_s21 = smov [#allocation6]  }
  0x1d   :  { %v1771_v24 = vld [vmem:[#allocation2 + $0x140] ss:$8 sps:$4 sm:$0xff]   ;;  %v1761_v25 = vld [vmem:[#allocation2 + $0x70] ss:$8 sps:$4 sm:$0xff]   ;;  %v55_v42 = vsub.s32 0, %v2006_v41  ;;  %v59_v44 = vsub.s32 1, %v2006_v41 }
  0x1e   :  { %154 = vmatpush1.bf16.msra.mxu0 %v1746_v6  ;;  %1515 = vmatpush3.bf16.msra.mxu1 %v1766_v15  ;;  %v1772_v26 = vld [vmem:[#allocation2 + $0xc0] ss:$8 sps:$4 sm:$0xff]   ;;  %v1773_v27 = vld [vmem:[#allocation2 + $0x150] ss:$8 sps:$4 sm:$0xff]   ;;  %s1382_s22 = sshll.u32 %s1953_s21, 4  ;;  %s1383_s22 = int_to_ptr.vmem [resolvable:$true] %s1382_s22 }
  0x1f   :  { %155 = vmatprep.subr.bf16.mxu0 %v1747_v7  ;;  %1516 = vmatprep.subr.bf16.mxu1 %v1767_v16  ;;  %v1762_v28 = vld [vmem:[%s2132_s0] sm:$0xff]   ;;  %v1774_v29 = vld [vmem:[#allocation2 + $0xd0] ss:$8 sps:$4 sm:$0xff]   ;;  %s1897_s23 = scalar_lea.vmem %s1383_s22, 256  ;;  %p1902_p9 = scmp.lt.s32.totalorder %s1383_s22, %s1383_s22 }
  0x20   :  { %v1775_v30 = vld [vmem:[#allocation2 + $0x160] ss:$8 sps:$4 sm:$0xff]   ;;  %v1777_v32 = vld [vmem:[#allocation2 + $0x170] ss:$8 sps:$4 sm:$0xff]   ;;  %p1898_p8 = scmp.ne.s32.totalorder %s1383_s22, %s1897_s23  ;;  %p1903_p10 = scmp.lt.s32.totalorder %s1897_s23, %s1897_s23 }
  0x21   :  { %v1776_v31 = vld [vmem:[#allocation2 + $0xe0] ss:$8 sps:$4 sm:$0xff]   ;;  %v1778_v33 = vld [vmem:[#allocation2 + $0xf0] ss:$8 sps:$4 sm:$0xff]  }
  0x22   :  { %156 = vmatpush1.bf16.msra.mxu0 %v1749_v8  ;;  %1517 = vmatpush3.bf16.msra.mxu1 %v1768_v19  ;;  %v1779_v34 = vld [vmem:[#allocation2 + $0x180] ss:$8 sps:$4 sm:$0xff]   ;;  %v1780_v36 = vld [vmem:[#allocation2 + $0x190] ss:$8 sps:$4 sm:$0xff]   ;;  %p1904_p11 = por %p1903_p10, %p1902_p9 }
  0x23   :  { %157 = vmatprep.subr.bf16.mxu0 %v1750_v9  ;;  %1518 = vmatprep.subr.bf16.mxu1 %v1769_v20  ;;  %v1781_v37 = vld [vmem:[#allocation2 + $0x1a0] ss:$8 sps:$4 sm:$0xff]   ;;  %v1782_v38 = vld [vmem:[#allocation2 + $0x1b0] ss:$8 sps:$4 sm:$0xff]  }
  0x24   :  { %v1783_v39 = vld [vmem:[#allocation2 + $0x1c0] ss:$8 sps:$4 sm:$0xff]   ;;  %v1784_v61 = vld [vmem:[#allocation2 + $0x1d0] ss:$8 sps:$4 sm:$0xff]   ;;  %p1905_p12 = pnand %p1904_p11, %p1898_p8 }
  0x25   :  { %v51_v43 = vld [vmem:[%s2134_s2] ss:$8 sm:$0x3]  ;;  %v1786_v63 = vld [vmem:[#allocation2 + $0x1f0] ss:$8 sps:$4 sm:$0xff]  }
  0x26   :  { %158 = vmatpush1.bf16.msra.mxu0 %v1752_v11  ;;  %1519 = vmatpush3.bf16.msra.mxu1 %v1770_v23  ;;  %v56_v45 = vrot.slane %v51_v43, %v55_v42  ;;  %v60_v46 = vrot.slane %v51_v43, %v59_v44  ;;  %v1785_v62 = vld [vmem:[#allocation2 + $0x1e0] ss:$8 sps:$4 sm:$0xff]   ;;  %v1788_v2 = vld [vmem:[#allocation2 + $0x210] ss:$8 sps:$4 sm:$0xff]  }
  0x27   :  { %159 = vmatprep.subr.bf16.mxu0 %v1753_v13  ;;  %1520 = vmatprep.subr.bf16.mxu1 %v1771_v24  ;;  %v1787_v1 = vld [vmem:[#allocation2 + $0x200] ss:$8 sps:$4 sm:$0xff]   ;;  %v1790_v4 = vld [vmem:[#allocation2 + $0x230] ss:$8 sps:$4 sm:$0xff]  }
  0x28   :  { %v1789_v3 = vld [vmem:[#allocation2 + $0x220] ss:$8 sps:$4 sm:$0xff]   ;;  %v1792_v6 = vld [vmem:[#allocation2 + $0x250] ss:$8 sps:$4 sm:$0xff]  }
  0x29   :  { %v1791_v5 = vld [vmem:[#allocation2 + $0x240] ss:$8 sps:$4 sm:$0xff]   ;;  %v1794_v20 = vld [vmem:[#allocation2 + $0x270] ss:$8 sps:$4 sm:$0xff]  }
  0x2a   :  { %160 = vmatpush1.bf16.msra.mxu0 %v1755_v17  ;;  %1521 = vmatpush3.bf16.msra.mxu1 %v1772_v26  ;;  %v228_v8 = vld [vmem:[%s2134_s2 + $0x1] ss:$0 sm:$0xff]  ;;  %v1798_v24 = vld [vmem:[#allocation2 + $0x2b0] ss:$8 sps:$4 sm:$0xff]  }
  0x2b   :  { %161 = vmatprep.subr.bf16.mxu0 %v1756_v18  ;;  %1522 = vmatprep.subr.bf16.mxu1 %v1773_v27  ;;  %v1793_v19 = vld [vmem:[#allocation2 + $0x260] ss:$8 sps:$4 sm:$0xff]   ;;  %v1800_v26 = vld [vmem:[#allocation2 + $0x2d0] ss:$8 sps:$4 sm:$0xff]  }
  0x2c   :  { %v1797_v23 = vld [vmem:[#allocation2 + $0x2a0] ss:$8 sps:$4 sm:$0xff]   ;;  %v1804_v43 = vld [vmem:[#allocation2 + $0x310] ss:$8 sps:$4 sm:$0xff]  }
  0x2d   :  { %v386_v27 = vld [vmem:[%s2134_s2 + $0x2] ss:$0 sm:$0xff] }
  0x2e   :  { %162 = vmatpush1.bf16.msra.mxu0 %v1758_v21  ;;  %1523 = vmatpush3.bf16.msra.mxu1 %v1774_v29  ;;  %v1795_v21 = vld [vmem:[#allocation2 + $0x280] ss:$8 sps:$4 sm:$0xff]  }
  0x2f   :  { %163 = vmatprep.subr.bf16.mxu0 %v1759_v22  ;;  %1524 = vmatprep.subr.bf16.mxu1 %v1775_v30  ;;  %v1796_v22 = vld [vmem:[#allocation2 + $0x290] ss:$8 sps:$4 sm:$0xff]   ;;  %v1803_v40 = vld [vmem:[#allocation2 + $0x300] ss:$8 sps:$4 sm:$0xff]  }
  0x32   :  { %164 = vmatpush1.bf16.msra.mxu0 %v1761_v25  ;;  %1525 = vmatpush3.bf16.msra.mxu1 %v1776_v31  ;;  %v1799_v25 = vld [vmem:[#allocation2 + $0x2c0] ss:$8 sps:$4 sm:$0xff]  }
  0x33   :  { %1526 = vmatprep.subr.bf16.mxu1 %v1777_v32  ;;  %1610 = vmatprep.subr.bf16.mxu0 %v1951_v35 }
  0x35   :  { %182 = vmatmul.mubr.bf16.vlgmr.msra.gmra.mrb[0].mxu0 %v1762_v28 }
  0x36   :  { %1527 = vmatpush3.bf16.msra.mxu1 %v1778_v33  ;;  %1611 = vmatpush3.bf16.msra.mxu0 %v1779_v34 }
  0x37   :  { %1630 = vmatprep.subr.bf16.mxu1 %v1951_v35  ;;  %1612 = vmatprep.subr.bf16.mxu0 %v1951_v35 }
  0x38   :  { %1626 = vmatprep.mubr.msk.bf16.mxu0 %vm1952_vm0, %v1951_v35 }
  0x3a   :  { %1613 = vmatpush3.bf16.msra.mxu0 %v1780_v36 }
  0x3b   :  { %1614 = vmatprep.subr.bf16.mxu0 %v1951_v35 }
  0x3e   :  { %1615 = vmatpush3.bf16.msra.mxu0 %v1781_v37 }
  0x3f   :  { %1616 = vmatprep.subr.bf16.mxu0 %v1951_v35 }
  0x42   :  { %1617 = vmatpush3.bf16.msra.mxu0 %v1782_v38  ;;  %v1801_v38 = vld [vmem:[#allocation2 + $0x2e0] ss:$8 sps:$4 sm:$0xff]  }
  0x43   :  { %1618 = vmatprep.subr.bf16.mxu0 %v1951_v35 }
  0x46   :  { %1619 = vmatpush3.bf16.msra.mxu0 %v1783_v39  ;;  %v1802_v39 = vld [vmem:[#allocation2 + $0x2f0] ss:$8 sps:$4 sm:$0xff]  }
  0x47   :  { %1620 = vmatprep.subr.bf16.mxu0 %v1951_v35 }
  0x4a   :  { %1621 = vmatpush3.bf16.msra.mxu0 %v1784_v61  ;;  %v1811_v61 = vld [vmem:[#allocation2 + $0x380] ss:$8 sps:$4 sm:$0xff]  }
  0x4b   :  { %1622 = vmatprep.subr.bf16.mxu0 %v1951_v35 }
  0x4e   :  { %1623 = vmatpush3.bf16.msra.mxu0 %v1785_v62  ;;  %v1812_v62 = vld [vmem:[#allocation2 + $0x390] ss:$8 sps:$4 sm:$0xff]  }
  0x4f   :  { %1624 = vmatprep.subr.bf16.mxu0 %v1951_v35 }
  0x52   :  { %1625 = vmatpush3.bf16.msra.mxu0 %v1786_v63  ;;  %v1813_v63 = vld [vmem:[#allocation2 + $0x3a0] ss:$8 sps:$4 sm:$0xff]  }
  0x53   :  { %1650 = vmatprep.subr.bf16.mxu0 %v1951_v35 }
 0x108   :  { %v183_v47 = vpop.f32.mrb[0].mxu0 }
 0x109   :  { %v184_v48 = vadd.f32 %v183_v47, %v56_v45  ;;  %v185_v49 = vpop.f32.mrb[1].mxu0  ;;  %v1807_v47 = vld [vmem:[#allocation2 + $0x340] ss:$8 sps:$4 sm:$0xff]  }
 0x10a   :  { %v186_v50 = vadd.f32 %v185_v49, %v60_v46  ;;  %v187_v51 = vpop.f32.mrb[2].mxu0  ;;  %v495_v49 = vld [vmem:[%s2134_s2 + $0x3] ss:$0 sm:$0xff] }
 0x10b   :  { %v188_v52 = vadd.f32 %v187_v51, %v56_v45  ;;  %v189_v53 = vpop.f32.mrb[3].mxu0  ;;  %v192_v55 = vmax.f32 %v184_v48, 0.0  ;;  %v1805_v45 = vld [vmem:[#allocation2 + $0x320] ss:$8 sps:$4 sm:$0xff]   ;;  %v1808_v48 = vld [vmem:[#allocation2 + $0x350] ss:$8 sps:$4 sm:$0xff]  }
 0x10c   :  { %v190_v54 = vadd.f32 %v189_v53, %v60_v46  ;;  %v193_v57 = vmax.f32 %v186_v50, 0.0  ;;  %v1806_v46 = vld [vmem:[#allocation2 + $0x330] ss:$8 sps:$4 sm:$0xff]  }
 0x10d   :  { %v194_v56 = vmax.f32 %v188_v52, 0.0 }
 0x10e   :  { %v195_v58 = vmax.f32 %v190_v54, 0.0 }
 0x10f   :  { %v229_v59 = vpack.c.bf16 %v194_v56, %v192_v55 }
 0x110   :  { %v230_v60 = vpack.c.bf16 %v195_v58, %v193_v57 }
 0x112   :  { %359 = vmatprep.mubr.bf16.mxu1 %v230_v60  ;;  %v1810_v60 = vld [vmem:[#allocation2 + $0x370] ss:$8 sps:$4 sm:$0xff]  }
 0x113   :  { %360 = vmatmul.mubr.bf16.vlgmr.msra.gmra.mrb[0].mxu1 %v229_v59  ;;  %v1809_v59 = vld [vmem:[#allocation2 + $0x360] ss:$8 sps:$4 sm:$0xff]  }
 0x114   :  { %1646 = vmatprep.mubr.msk.bf16.mxu1 %vm1952_vm0, %v1951_v35  ;;  %1631 = vmatpush3.bf16.msra.mxu1 %v1787_v1  ;;  %v1814_v1 = vld [vmem:[#allocation2 + $0x3b0] ss:$8 sps:$4 sm:$0xff]  }
 0x115   :  { %1632 = vmatprep.subr.bf16.mxu1 %v1951_v35 }
 0x118   :  { %1633 = vmatpush3.bf16.msra.mxu1 %v1788_v2  ;;  %v1815_v2 = vld [vmem:[#allocation2 + $0x3c0] ss:$8 sps:$4 sm:$0xff]  }
 0x119   :  { %1634 = vmatprep.subr.bf16.mxu1 %v1951_v35 }
 0x11c   :  { %1635 = vmatpush3.bf16.msra.mxu1 %v1789_v3  ;;  %v1816_v3 = vld [vmem:[#allocation2 + $0x3d0] ss:$8 sps:$4 sm:$0xff]  }
 0x11d   :  { %1636 = vmatprep.subr.bf16.mxu1 %v1951_v35 }
 0x120   :  { %1637 = vmatpush3.bf16.msra.mxu1 %v1790_v4  ;;  %v604_v4 = vld [vmem:[%s2134_s2 + $0x4] ss:$0 sm:$0xff] }
 0x121   :  { %1638 = vmatprep.subr.bf16.mxu1 %v1951_v35 }
 0x124   :  { %1639 = vmatpush3.bf16.msra.mxu1 %v1791_v5 }
 0x125   :  { %1640 = vmatprep.subr.bf16.mxu1 %v1951_v35 }
 0x128   :  { %1641 = vmatpush3.bf16.msra.mxu1 %v1792_v6 }
 0x129   :  { %1642 = vmatprep.subr.bf16.mxu1 %v1951_v35 }
 0x12c   :  { %1643 = vmatpush3.bf16.msra.mxu1 %v1793_v19  ;;  %v1824_v19 = vld [vmem:[#allocation2 + $0x450] ss:$8 sps:$4 sm:$0xff]  }
 0x12d   :  { %1644 = vmatprep.subr.bf16.mxu1 %v1951_v35 }
 0x130   :  { %1645 = vmatpush3.bf16.msra.mxu1 %v1794_v20  ;;  %v713_v20 = vld [vmem:[%s2134_s2 + $0x5] ss:$0 sm:$0xff] }
 0x131   :  { %1670 = vmatprep.subr.bf16.mxu1 %v1951_v35 }
 0x1e6   :  { %v1528_v7 = vpop.f32.mrb[0].mxu1 }
 0x1e7   :  { %v1529_v9 = vpop.f32.mrb[1].mxu1 }
 0x1e8   :  { %v1530_v10 = vadd.f32 %v1529_v9, %v1528_v7  ;;  %v1531_v11 = vpop.f32.mrb[2].mxu1 }
 0x1e9   :  { %v1532_v12 = vpop.f32.mrb[3].mxu1 }
 0x1ea   :  { %v362_v13 = vadd.f32 %v1530_v10, %v228_v8  ;;  %v1533_v14 = vadd.f32 %v1532_v12, %v1531_v11  ;;  %v1817_v12 = vld [vmem:[#allocation2 + $0x3e0] ss:$8 sps:$4 sm:$0xff]  }
 0x1ec   :  { %v365_v15 = vadd.f32 %v1533_v14, %v228_v8  ;;  %v368_v16 = vmax.f32 %v362_v13, 0.0  ;;  %v1818_v13 = vld [vmem:[#allocation2 + $0x3f0] ss:$8 sps:$4 sm:$0xff]   ;;  %v1819_v14 = vld [vmem:[#allocation2 + $0x400] ss:$8 sps:$4 sm:$0xff]  }
 0x1ee   :  { %v369_v17 = vmax.f32 %v365_v15, 0.0  ;;  %v1820_v15 = vld [vmem:[#allocation2 + $0x410] ss:$8 sps:$4 sm:$0xff]  }
 0x1f0   :  { %v387_v18 = vpack.c.bf16 %v369_v17, %v368_v16  ;;  %v1821_v16 = vld [vmem:[#allocation2 + $0x420] ss:$8 sps:$4 sm:$0xff]   ;;  %v1822_v17 = vld [vmem:[#allocation2 + $0x430] ss:$8 sps:$4 sm:$0xff]  }
 0x1f2   :  { %1627 = vmatmul.mubr.bf16.vlgmr.msra.gmra.mrb[4].mxu0 %v387_v18  ;;  %v1823_v18 = vld [vmem:[#allocation2 + $0x440] ss:$8 sps:$4 sm:$0xff]  }
 0x1f3   :  { %1666 = vmatprep.mubr.msk.bf16.mxu0 %vm1952_vm0, %v1951_v35  ;;  %1651 = vmatpush3.bf16.msra.mxu0 %v1795_v21 }
 0x1f4   :  { %1652 = vmatprep.subr.bf16.mxu0 %v1951_v35 }
 0x1f7   :  { %1653 = vmatpush3.bf16.msra.mxu0 %v1796_v22 }
 0x1f8   :  { %1654 = vmatprep.subr.bf16.mxu0 %v1951_v35 }
 0x1fb   :  { %1655 = vmatpush3.bf16.msra.mxu0 %v1797_v23 }
 0x1fc   :  { %1656 = vmatprep.subr.bf16.mxu0 %v1951_v35 }
 0x1ff   :  { %1657 = vmatpush3.bf16.msra.mxu0 %v1798_v24 }
 0x200   :  { %1658 = vmatprep.subr.bf16.mxu0 %v1951_v35 }
 0x203   :  { %1659 = vmatpush3.bf16.msra.mxu0 %v1799_v25 }
 0x204   :  { %1660 = vmatprep.subr.bf16.mxu0 %v1951_v35 }
 0x207   :  { %1661 = vmatpush3.bf16.msra.mxu0 %v1800_v26 }
 0x208   :  { %1662 = vmatprep.subr.bf16.mxu0 %v1951_v35 }
 0x20b   :  { %1663 = vmatpush3.bf16.msra.mxu0 %v1801_v38  ;;  %v1833_v38 = vld [vmem:[#allocation2 + $0x4a0] ss:$8 sps:$4 sm:$0xff]  }
 0x20c   :  { %1664 = vmatprep.subr.bf16.mxu0 %v1951_v35 }
 0x20f   :  { %1665 = vmatpush3.bf16.msra.mxu0 %v1802_v39  ;;  %v1838_v39 = vld [vmem:[#allocation2 + $0x4b4] ss:$8 sps:$4 sm:$0xff]  }
 0x210   :  { %1690 = vmatprep.subr.bf16.mxu0 %v1951_v35 }
 0x2c5   :  { %v470_v28 = vpop.f32.mrb[4].mxu0 }
 0x2c6   :  { %v471_v29 = vadd.f32 %v470_v28, %v386_v27  ;;  %v1628_v30 = vpop.f32.mrb[5].mxu0 }
 0x2c7   :  { %v473_v31 = vpop.f32.mrb[6].mxu0  ;;  %v1825_v30 = vld [vmem:[#allocation2 + $0x460] ss:$8 sps:$4 sm:$0xff]  }
 0x2c8   :  { %v474_v32 = vadd.f32 %v473_v31, %v386_v27  ;;  %v1629_v33 = vpop.f32.mrb[7].mxu0  ;;  %v477_v34 = vmax.f32 %v471_v29, 0.0  ;;  %v1826_v31 = vld [vmem:[#allocation2 + $0x470] ss:$8 sps:$4 sm:$0xff]  }
 0x2c9   :  { %v1829_v33 = vld [vmem:[#allocation2 + $0x484] ss:$8 sps:$4 sm:$0xff]  }
 0x2ca   :  { %v478_v36 = vmax.f32 %v474_v32, 0.0  ;;  %v1827_v32 = vld [vmem:[#allocation2 + $0x480] ss:$8 sps:$4 sm:$0xff]  }
 0x2cc   :  { %v496_v37 = vpack.c.bf16 %v478_v36, %v477_v34  ;;  %v1832_v34 = vld [vmem:[#allocation2 + $0x494] ss:$8 sps:$4 sm:$0xff]   ;;  %v1830_v36 = vld [vmem:[#allocation2 + $0x490] ss:$8 sps:$4 sm:$0xff]  }
 0x2ce   :  { %1647 = vmatmul.mubr.bf16.vlgmr.msra.gmra.mrb[4].mxu1 %v496_v37  ;;  %v1835_v37 = vld [vmem:[#allocation2 + $0x4a4] ss:$8 sps:$4 sm:$0xff]  }
 0x2cf   :  { %1686 = vmatprep.mubr.msk.bf16.mxu1 %vm1952_vm0, %v1951_v35  ;;  %1671 = vmatpush3.bf16.msra.mxu1 %v1803_v40  ;;  %v1841_v40 = vld [vmem:[#allocation2 + $0x4c4] ss:$8 sps:$4 sm:$0xff]  }
 0x2d0   :  { %1672 = vmatprep.subr.bf16.mxu1 %v1951_v35 }
 0x2d3   :  { %1673 = vmatpush3.bf16.msra.mxu1 %v1804_v43  ;;  %v1844_v43 = vld [vmem:[#allocation2 + $0x4d4] ss:$8 sps:$4 sm:$0xff]  }
 0x2d4   :  { %1674 = vmatprep.subr.bf16.mxu1 %v1951_v35 }
 0x2d7   :  { %1675 = vmatpush3.bf16.msra.mxu1 %v1805_v45  ;;  %v1842_v45 = vld [vmem:[#allocation2 + $0x4d0] ss:$8 sps:$4 sm:$0xff]  }
 0x2d8   :  { %1676 = vmatprep.subr.bf16.mxu1 %v1951_v35 }
 0x2db   :  { %1677 = vmatpush3.bf16.msra.mxu1 %v1806_v46  ;;  %v822_v46 = vld [vmem:[%s2134_s2 + $0x6] ss:$0 sm:$0xff] }
 0x2dc   :  { %1678 = vmatprep.subr.bf16.mxu1 %v1951_v35 }
 0x2df   :  { %1679 = vmatpush3.bf16.msra.mxu1 %v1807_v47 }
 0x2e0   :  { %1680 = vmatprep.subr.bf16.mxu1 %v1951_v35 }
 0x2e3   :  { %1681 = vmatpush3.bf16.msra.mxu1 %v1808_v48 }
 0x2e4   :  { %1682 = vmatprep.subr.bf16.mxu1 %v1951_v35 }
 0x2e7   :  { %1683 = vmatpush3.bf16.msra.mxu1 %v1809_v59  ;;  %v1848_v59 = vld [vmem:[#allocation2 + $0x4f0] ss:$8 sps:$4 sm:$0xff]  }
 0x2e8   :  { %1684 = vmatprep.subr.bf16.mxu1 %v1951_v35 }
 0x2eb   :  { %1685 = vmatpush3.bf16.msra.mxu1 %v1810_v60  ;;  %v1851_v60 = vld [vmem:[#allocation2 + $0x580] ss:$8 sps:$4 sm:$0xff]  }
 0x2ec   :  { %1710 = vmatprep.subr.bf16.mxu1 %v1951_v35 }
 0x3a1   :  { %v579_v50 = vpop.f32.mrb[4].mxu1 }
 0x3a2   :  { %v580_v51 = vadd.f32 %v579_v50, %v495_v49  ;;  %v1648_v52 = vpop.f32.mrb[5].mxu1 }
 0x3a3   :  { %v582_v53 = vpop.f32.mrb[6].mxu1 }
 0x3a4   :  { %v583_v54 = vadd.f32 %v582_v53, %v495_v49  ;;  %v1649_v55 = vpop.f32.mrb[7].mxu1  ;;  %v586_v56 = vmax.f32 %v580_v51, 0.0 }
 0x3a6   :  { %v587_v57 = vmax.f32 %v583_v54, 0.0 }
 0x3a8   :  { %v605_v58 = vpack.c.bf16 %v587_v57, %v586_v56  ;;  %v1847_v56 = vld [vmem:[#allocation2 + $0x4e4] ss:$8 sps:$4 sm:$0xff]   ;;  %v1845_v57 = vld [vmem:[#allocation2 + $0x4e0] ss:$8 sps:$4 sm:$0xff]  }
 0x3aa   :  { %1667 = vmatmul.mubr.bf16.vlgmr.msra.gmra.mrb[8].mxu0 %v605_v58  ;;  %v1850_v58 = vld [vmem:[#allocation2 + $0x4f4] ss:$8 sps:$4 sm:$0xff]  }
 0x3ab   :  { %1706 = vmatprep.mubr.msk.bf16.mxu0 %vm1952_vm0, %v1951_v35  ;;  %1691 = vmatpush3.bf16.msra.mxu0 %v1811_v61  ;;  %v1852_v61 = vld [vmem:[#allocation2 + $0x500] ss:$8 sps:$4 sm:$0xff]  }
 0x3ac   :  { %1692 = vmatprep.subr.bf16.mxu0 %v1951_v35 }
 0x3af   :  { %1693 = vmatpush3.bf16.msra.mxu0 %v1812_v62  ;;  %v1853_v62 = vld [vmem:[#allocation2 + $0x590] ss:$8 sps:$4 sm:$0xff]  }
 0x3b0   :  { %1694 = vmatprep.subr.bf16.mxu0 %v1951_v35 }
 0x3b3   :  { %1695 = vmatpush3.bf16.msra.mxu0 %v1813_v63  ;;  %v1854_v63 = vld [vmem:[#allocation2 + $0x510] ss:$8 sps:$4 sm:$0xff]  }
 0x3b4   :  { %1696 = vmatprep.subr.bf16.mxu0 %v1951_v35 }
 0x3b7   :  { %1697 = vmatpush3.bf16.msra.mxu0 %v1814_v1  ;;  %v1855_v1 = vld [vmem:[#allocation2 + $0x5a0] ss:$8 sps:$4 sm:$0xff]  }
 0x3b8   :  { %1698 = vmatprep.subr.bf16.mxu0 %v1951_v35 }
 0x3bb   :  { %1699 = vmatpush3.bf16.msra.mxu0 %v1815_v2  ;;  %v1856_v2 = vld [vmem:[#allocation2 + $0x520] ss:$8 sps:$4 sm:$0xff]  }
 0x3bc   :  { %1700 = vmatprep.subr.bf16.mxu0 %v1951_v35 }
 0x3bf   :  { %1701 = vmatpush3.bf16.msra.mxu0 %v1816_v3  ;;  %v1857_v3 = vld [vmem:[#allocation2 + $0x5b0] ss:$8 sps:$4 sm:$0xff]  }
 0x3c0   :  { %1702 = vmatprep.subr.bf16.mxu0 %v1951_v35 }
 0x3c3   :  { %1703 = vmatpush3.bf16.msra.mxu0 %v1817_v12 }
 0x3c4   :  { %1704 = vmatprep.subr.bf16.mxu0 %v1951_v35 }
 0x3c7   :  { %1705 = vmatpush3.bf16.msra.mxu0 %v1818_v13 }
 0x3c8   :  { %1134 = vmatprep.subr.bf16.mxu0 %v1829_v33 }
 0x47d   :  { %v688_v5 = vpop.f32.mrb[8].mxu0 }
 0x47e   :  { %v689_v6 = vadd.f32 %v688_v5, %v604_v4  ;;  %v1668_v7 = vpop.f32.mrb[9].mxu0  ;;  %v1859_v5 = vld [vmem:[#allocation2 + $0x5c0] ss:$8 sps:$4 sm:$0xff]  }
 0x47f   :  { %v691_v8 = vpop.f32.mrb[10].mxu0  ;;  %v1861_v7 = vld [vmem:[#allocation2 + $0x5d0] ss:$8 sps:$4 sm:$0xff]  }
 0x480   :  { %695 = vst [vmem:[#allocation6] sm:$0xff] %v689_v6  ;;  %v692_v9 = vadd.f32 %v691_v8, %v604_v4  ;;  %v1669_v10 = vpop.f32.mrb[11].mxu0  ;;  %v1858_v4 = vld [vmem:[#allocation2 + $0x530] ss:$8 sps:$4 sm:$0xff]   ;;  %v931_v8 = vld [vmem:[%s2134_s2 + $0x7] ss:$0 sm:$0xff] }
 0x482   :  { %696 = vst [vmem:[#allocation6 + $0x8] sm:$0xff] %v692_v9  ;;  %v714_v11 = vpack.c.bf16 %v692_v9, %v689_v6  ;;  %v1860_v6 = vld [vmem:[#allocation2 + $0x540] ss:$8 sps:$4 sm:$0xff]  }
 0x484   :  { %1687 = vmatmul.mubr.bf16.vlgmr.msra.gmra.mrb[8].mxu1 %v714_v11 }
 0x485   :  { %1726 = vmatprep.mubr.msk.bf16.mxu1 %vm1952_vm0, %v1951_v35  ;;  %1711 = vmatpush3.bf16.msra.mxu1 %v1819_v14 }
 0x486   :  { %1712 = vmatprep.subr.bf16.mxu1 %v1951_v35 }
 0x489   :  { %1713 = vmatpush3.bf16.msra.mxu1 %v1820_v15 }
 0x48a   :  { %1714 = vmatprep.subr.bf16.mxu1 %v1951_v35 }
 0x48d   :  { %1715 = vmatpush3.bf16.msra.mxu1 %v1821_v16 }
 0x48e   :  { %1716 = vmatprep.subr.bf16.mxu1 %v1951_v35 }
 0x491   :  { %1717 = vmatpush3.bf16.msra.mxu1 %v1822_v17 }
 0x492   :  { %1718 = vmatprep.subr.bf16.mxu1 %v1951_v35 }
 0x495   :  { %1719 = vmatpush3.bf16.msra.mxu1 %v1823_v18  ;;  %v1862_v18 = vld [vmem:[#allocation2 + $0x550] ss:$8 sps:$4 sm:$0xff]  }
 0x496   :  { %1720 = vmatprep.subr.bf16.mxu1 %v1951_v35 }
 0x499   :  { %1721 = vmatpush3.bf16.msra.mxu1 %v1824_v19  ;;  %v1863_v19 = vld [vmem:[#allocation2 + $0x5e0] ss:$8 sps:$4 sm:$0xff]  }
 0x49a   :  { %1722 = vmatprep.subr.bf16.mxu1 %v1951_v35 }
 0x49d   :  { %1723 = vmatpush3.bf16.msra.mxu1 %v1825_v30 }
 0x49e   :  { %1724 = vmatprep.subr.bf16.mxu1 %v1951_v35  ;;  %v1839_v35 = vld [vmem:[#allocation2 + $0x4c0] ss:$8 sps:$4 sm:$0xff]  }
 0x4a1   :  { %1725 = vmatpush3.bf16.msra.mxu1 %v1826_v31 }
 0x4a2   :  { %1588 = vmatprep.subr.bf16.mxu1 %v1851_v60 }
 0x557   :  { %v797_v21 = vpop.f32.mrb[8].mxu1 }
 0x558   :  { %v798_v22 = vadd.f32 %v797_v21, %v713_v20  ;;  %v1688_v23 = vpop.f32.mrb[9].mxu1  ;;  %v1865_v21 = vld [vmem:[#allocation2 + $0x5f0] ss:$8 sps:$4 sm:$0xff]  }
 0x559   :  { %v800_v24 = vpop.f32.mrb[10].mxu1  ;;  %v1479_v23 = vld [vmem:[%s2134_s2 + $0x10] ss:$8 sm:$0x3] }
 0x55a   :  { %v801_v25 = vadd.f32 %v800_v24, %v713_v20  ;;  %v1689_v26 = vpop.f32.mrb[11].mxu1  ;;  %v804_v27 = vmax.f32 %v798_v22, 0.0  ;;  %v1864_v20 = vld [vmem:[#allocation2 + $0x560] ss:$8 sps:$4 sm:$0xff]   ;;  %v1866_v22 = vld [vmem:[#allocation2 + $0x570] ss:$8 sps:$4 sm:$0xff]   ;;  %v1047_v24 = vrot.slane %v1479_v23, %v55_v42 }
 0x55c   :  { %v805_v28 = vmax.f32 %v801_v25, 0.0  ;;  %v1051_v25 = vrot.slane %v1479_v23, %v59_v44 }
 0x55e   :  { %v823_v29 = vpack.c.bf16 %v805_v28, %v804_v27 }
 0x560   :  { %1707 = vmatmul.mubr.bf16.vlgmr.msra.gmra.mrb[12].mxu0 %v823_v29 }
 0x561   :  { %1166 = vmatprep.mubr.bf16.mxu0 %v1950_v0  ;;  %1135 = vmatpush1.bf16.msra.mxu0 %v1827_v32  ;;  %v1836_v0 = vld [vmem:[#allocation2 + $0x4b0] ss:$8 sps:$4 sm:$0xff]  }
 0x562   :  { %1136 = vmatprep.subr.bf16.mxu0 %v1832_v34 }
 0x565   :  { %1137 = vmatpush1.bf16.msra.mxu0 %v1830_v36 }
 0x566   :  { %1138 = vmatprep.subr.bf16.mxu0 %v1835_v37 }
 0x569   :  { %1139 = vmatpush1.bf16.msra.mxu0 %v1833_v38 }
 0x56a   :  { %1140 = vmatprep.subr.bf16.mxu0 %v1838_v39 }
 0x56d   :  { %1141 = vmatpush1.bf16.msra.mxu0 %v1836_v0 }
 0x56e   :  { %1142 = vmatprep.subr.bf16.mxu0 %v1841_v40 }
 0x571   :  { %1143 = vmatpush1.bf16.msra.mxu0 %v1839_v35 }
 0x572   :  { %1144 = vmatprep.subr.bf16.mxu0 %v1844_v43 }
 0x575   :  { %1145 = vmatpush1.bf16.msra.mxu0 %v1842_v45 }
 0x576   :  { %1146 = vmatprep.subr.bf16.mxu0 %v1847_v56 }
 0x579   :  { %1147 = vmatpush1.bf16.msra.mxu0 %v1845_v57 }
 0x57a   :  { %1148 = vmatprep.subr.bf16.mxu0 %v1850_v58 }
 0x57d   :  { %1149 = vmatpush1.bf16.msra.mxu0 %v1848_v59 }
 0x633   :  { %v906_v47 = vpop.f32.mrb[12].mxu0 }
 0x634   :  { %v907_v48 = vadd.f32 %v906_v47, %v822_v46  ;;  %v1708_v49 = vpop.f32.mrb[13].mxu0 }
 0x635   :  { %v909_v50 = vpop.f32.mrb[14].mxu0 }
 0x636   :  { %v910_v51 = vadd.f32 %v909_v50, %v822_v46  ;;  %v1709_v52 = vpop.f32.mrb[15].mxu0  ;;  %v913_v53 = vmax.f32 %v907_v48, 0.0 }
 0x638   :  { %v914_v54 = vmax.f32 %v910_v51, 0.0 }
 0x63a   :  { %v932_v55 = vpack.c.bf16 %v914_v54, %v913_v53 }
 0x63c   :  { %1727 = vmatmul.mubr.bf16.vlgmr.msra.gmra.mrb[12].mxu1 %v932_v55 }
 0x63d   :  { %1589 = vmatpush3.bf16.msra.mxu1 %v1852_v61 }
 0x63e   :  { %1590 = vmatprep.subr.bf16.mxu1 %v1853_v62 }
 0x641   :  { %1591 = vmatpush3.bf16.msra.mxu1 %v1854_v63 }
 0x642   :  { %1592 = vmatprep.subr.bf16.mxu1 %v1855_v1 }
 0x645   :  { %1593 = vmatpush3.bf16.msra.mxu1 %v1856_v2 }
 0x646   :  { %1594 = vmatprep.subr.bf16.mxu1 %v1857_v3 }
 0x649   :  { %1595 = vmatpush3.bf16.msra.mxu1 %v1858_v4 }
 0x64a   :  { %1596 = vmatprep.subr.bf16.mxu1 %v1859_v5 }
 0x64d   :  { %1597 = vmatpush3.bf16.msra.mxu1 %v1860_v6 }
 0x64e   :  { %1598 = vmatprep.subr.bf16.mxu1 %v1861_v7 }
 0x651   :  { %1599 = vmatpush3.bf16.msra.mxu1 %v1862_v18 }
 0x652   :  { %1600 = vmatprep.subr.bf16.mxu1 %v1863_v19 }
 0x655   :  { %1601 = vmatpush3.bf16.msra.mxu1 %v1864_v20 }
 0x656   :  { %1602 = vmatprep.subr.bf16.mxu1 %v1865_v21 }
 0x659   :  { %1603 = vmatpush3.bf16.msra.mxu1 %v1866_v22 }
 0x70f   :  { %v1015_v9 = vpop.f32.mrb[12].mxu1 }
 0x710   :  { %v1016_v10 = vadd.f32 %v1015_v9, %v931_v8  ;;  %v1728_v11 = vpop.f32.mrb[13].mxu1 }
 0x711   :  { %v1018_v12 = vpop.f32.mrb[14].mxu1 }
 0x712   :  { %v1019_v13 = vadd.f32 %v1018_v12, %v931_v8  ;;  %v1729_v14 = vpop.f32.mrb[15].mxu1  ;;  %v1022_v15 = vmax.f32 %v1016_v10, 0.0 }
 0x714   :  { %v1023_v16 = vmax.f32 %v1019_v13, 0.0 }
 0x716   :  { %v1042_v17 = vpack.c.bf16 %v1023_v16, %v1022_v15 }
 0x718   :  { %1167 = vmatmul.mubr.bf16.vlgmr.msra.gmra.mrb[16].mxu0 %v1042_v17 }
 0x7eb   :  { %v1168_v26 = vpop.f32.mrb[16].mxu0 }
 0x7ec   :  { %v1169_v27 = vadd.f32 %v1168_v26, %v1047_v24  ;;  %v1170_v28 = vpop.f32.mrb[17].mxu0 }
 0x7ed   :  { %v1171_v29 = vadd.f32 %v1170_v28, %v1051_v25  ;;  %v1172_v30 = vpop.f32.mrb[18].mxu0 }
 0x7ee   :  { %v1173_v31 = vadd.f32 %v1172_v30, %v1047_v24  ;;  %v1174_v32 = vpop.f32.mrb[19].mxu0  ;;  %v1177_v34 = vmax.f32 %v1169_v27, 0.0 }
 0x7ef   :  { %v1175_v33 = vadd.f32 %v1174_v32, %v1051_v25  ;;  %v1178_v37 = vmax.f32 %v1171_v29, 0.0 }
 0x7f0   :  { %v1179_v36 = vmax.f32 %v1173_v31, 0.0 }
 0x7f1   :  { %v1180_v38 = vmax.f32 %v1175_v33, 0.0 }
 0x7f2   :  { %v1214_v39 = vpack.c.bf16 %v1179_v36, %v1177_v34 }
 0x7f3   :  { %v1215_v0 = vpack.c.bf16 %v1180_v38, %v1178_v37 }
 0x7f5   :  { %1344 = vmatprep.mubr.bf16.mxu1 %v1215_v0 }
 0x7f6   :  { %1345 = vmatmul.mubr.bf16.vlgmr.msra.gmra.mrb[16].mxu1 %v1214_v39 }
 0x7f7   :  { %1908 = shalt.err (!%p1905_p12)
}
 0x7f8   :  { %s1909_s28 = scalar_lea.hbm %s2136_s4, 256 }
 0x7f9   :  { %p1910_p13 = scmp.ne.s32.totalorder %s2136_s4, %s1909_s28  ;;  %p1913_p0 = scmp.lt.u32.totalorder %s1909_s28, %s2136_s4 }
 0x7fb   :  { %p1915_p1 = pnand %p1913_p0, %p1910_p13 }
 0x7fd   :  { %1918 = shalt.err (!%p1915_p1)
}
 0x7fe   :  { %1388 = dma.vmem_to_hbm [thread:$0]  %s1383_s22, 256, %s2136_s4, [#allocation7], %s1948_s25, %s1948_s25, %s1949_s26  }
 0x7ff   :  { %v1213_v42 = vld [vmem:[%s2134_s2 + $0x11] ss:$0 sm:$0xff]  ;;  %s1954_s2 = smov [#allocation5]  }
 0x800   :  { %s1370_s4 = sshll.u32 %s1954_s2, 4  ;;  %s1371_s4 = int_to_ptr.vmem [resolvable:$true] %s1370_s4 }
 0x801   :  { %s1919_s9 = scalar_lea.vmem %s1371_s4, 256  ;;  %p1924_p3 = scmp.lt.s32.totalorder %s1371_s4, %s1371_s4 }
 0x802   :  { %p1920_p2 = scmp.ne.s32.totalorder %s1371_s4, %s1919_s9  ;;  %p1925_p4 = scmp.lt.s32.totalorder %s1919_s9, %s1919_s9 }
 0x804   :  { %p1926_p5 = por %p1925_p4, %p1924_p3 }
 0x806   :  { %p1927_p6 = pnand %p1926_p5, %p1920_p2 }
 0x8c9   :  { %v1604_v41 = vpop.f32.mrb[16].mxu1 }
 0x8ca   :  { %v1605_v44 = vpop.f32.mrb[17].mxu1 }
 0x8cb   :  { %v1606_v40 = vadd.f32 %v1605_v44, %v1604_v41  ;;  %v1607_v35 = vpop.f32.mrb[18].mxu1 }
 0x8cc   :  { %v1608_v43 = vpop.f32.mrb[19].mxu1 }
 0x8cd   :  { %v1347_v45 = vadd.f32 %v1606_v40, %v1213_v42  ;;  %v1609_v46 = vadd.f32 %v1608_v43, %v1607_v35 }
 0x8cf   :  { %v1353_v47 = vsub.f32 0.0, %v1347_v45  ;;  %v1350_v48 = vadd.f32 %v1609_v46, %v1213_v42 }
 0x8d1   :  { %v1355_v49 = vmul.f32 1.442695, %v1353_v47  ;;  %v1354_v50 = vsub.f32 0.0, %v1350_v48 }
 0x8d3   :  { %1867 = vpow2.f32 %v1355_v49  ;;  %v1357_v51 = vmul.f32 1.442695, %v1354_v50 }
 0x8d5   :  { %1869 = vpow2.f32 %v1357_v51 }
 0x8dd   :  { %v1868_v52 = vpop.eup %1867 }
 0x8de   :  { %v1359_v53 = vadd.f32 1.0, %v1868_v52 }
 0x8df   :  { %v1870_v54 = vpop.eup %1869 }
 0x8e0   :  { %1871 = vrcp.f32 %v1359_v53  ;;  %v1360_v55 = vadd.f32 1.0, %v1870_v54 }
 0x8e2   :  { %1873 = vrcp.f32 %v1360_v55 }
 0x8ea   :  { %v1872_v56 = vpop.eup %1871 }
 0x8eb   :  { %1363 = vst [vmem:[#allocation5] sm:$0xff] %v1872_v56 }
 0x8ec   :  { %v1874_v57 = vpop.eup %1873 }
 0x8ed   :  { %1364 = vst [vmem:[#allocation5 + $0x8] sm:$0xff] %v1874_v57 }
 0x8ee   :  { %1930 = shalt.err (!%p1927_p6)
}
 0x8ef   :  { %s1931_s12 = scalar_lea.hbm %s2135_s3, 256 }
 0x8f0   :  { %p1932_p7 = scmp.ne.s32.totalorder %s2135_s3, %s1931_s12  ;;  %p1935_p8 = scmp.lt.u32.totalorder %s1931_s12, %s2135_s3 }
 0x8f2   :  { %p1937_p9 = pnand %p1935_p8, %p1932_p7 }
 0x8f4   :  { %1940 = shalt.err (!%p1937_p9)
}
 0x8f5   :  { %1376 = dma.vmem_to_hbm [thread:$0]  %s1371_s4, 256, %s2135_s3, [#allocation4], %s1948_s25, %s1948_s25, %s1949_s26  }
 0x8f6   :  { %1943 = dma.done.wait [#allocation4], 256  }
 0x8f7   :  { %1944 = vsyncadd [#allocation4], 4294967040 }
 0x8f8   :  { %1945 = dma.done.wait [#allocation7], 256  }
 0x8f9   :  { %1946 = vsyncadd [#allocation7], 4294967040 }
 0x8fa   :  { %1395 = vsyncpa [#allocation3], 1 }
 0x8fb   :  { %1396 = vsyncpa [#allocation4], 1 }
 0x8fc   :  { %1397 = vsyncpa [#allocation7], 1 }

</bundles_post_ra>
